<compile_context>
chip_gen: v5e
topology: v5e:2x2
jax: 0.10.0
libtpu: 0.0.40
codegen_flags: <defaults>
</compile_context>

<pallas_src>
import functools
import math

import jax
import jax.numpy as jnp
from jax.experimental import pallas as pl
from jax.experimental.pallas import tpu as pltpu


def _round_up(a, m):
    return (a + m - 1) // m * m


def mdn_fused_kernel(x_ref, w_ref, b_ref, out_ref, *, num_components, bias):
    """One fused MXU matmul + column-range activations; writes a lane-dense slab.

    Fused column layout (padded to a multiple of 128 with zeros):
        [0, K)      pi_hat      -> softmax
        [K, 3K)     mu_hat      -> identity
        [3K, 5K)    sd_hat      -> exp
        [5K, 6K)    ro_hat      -> tanh
        [6K]        eos_hat     -> sigmoid
        (6K, Wpad)  zero padding
    """
    K = num_components

    x = x_ref[...]
    # Single MXU matmul over the fused head (f32 accumulation) + bias add.
    fused = jnp.dot(x, w_ref[...], preferred_element_type=jnp.float32) + b_ref[...]
    W = fused.shape[-1]

    col = jax.lax.broadcasted_iota(jnp.int32, (1, W), 1)
    pi_m = col < K
    sd_m = (col >= 3 * K) & (col < 5 * K)
    ro_m = (col >= 5 * K) & (col < 6 * K)
    eos_m = col == 6 * K

    # `bias` must stay a static Python float (baked at trace time).
    if bias is None:
        pi_pre = fused
        sd_pre = fused
    else:
        b = float(bias)
        pi_pre = fused * (1.0 + b)
        sd_pre = fused - b

    neg_inf = jnp.float32(-jnp.inf)

    # Max over pi columns only (others masked to -inf) for a stable softmax.
    m = jnp.max(jnp.where(pi_m, pi_pre, neg_inf), axis=-1, keepdims=True)

    # ONE exp sweep: softmax numerator on pi columns, sd on sd columns,
    # exp(-inf) == 0 everywhere else (no incidental overflow on mu/ro/eos cols).
    exp_arg = jnp.where(pi_m, pi_pre - m,
                        jnp.where(sd_m, sd_pre, neg_inf))
    e = jnp.exp(exp_arg)

    denom = jnp.sum(jnp.where(pi_m, e, 0.0), axis=-1, keepdims=True)
    inv_denom = 1.0 / denom          # exact division: pi must sum to 1 to ~ulp

    # ONE tanh sweep: ro = tanh(x); eos = sigmoid(x) = 0.5 * (1 + tanh(x / 2)).
    t = jnp.tanh(jnp.where(eos_m, 0.5 * fused, fused))

    # Incremental merge keeps only ~2-3 full-tile temporaries live.
    out = fused                                   # mu columns (+ zero padding)
    out = jnp.where(pi_m, e * inv_denom, out)     # pi
    out = jnp.where(sd_m, e, out)                 # sd
    out = jnp.where(ro_m, t, out)                 # ro
    out = jnp.where(eos_m, 0.5 * t + 0.5, out)    # eos

    out_ref[...] = out.astype(out_ref.dtype)


def init_linear(key, in_features, out_features):
    """Deterministic nn.Linear-style init; weight stored transposed (in, out)."""
    kw, kb = jax.random.split(key)
    bound = 1.0 / math.sqrt(in_features)
    w = jax.random.uniform(kw, (in_features, out_features), jnp.float32, -bound, bound)
    b = jax.random.uniform(kb, (1, out_features), jnp.float32, -bound, bound)
    return w, b


def init_mdn_params(key, input_size, num_components):
    k_pi, k_mu, k_sd, k_ro, k_eos = jax.random.split(key, 5)
    wpi, bpi = init_linear(k_pi, input_size, num_components)
    wmu, bmu = init_linear(k_mu, input_size, num_components * 2)
    wsd, bsd = init_linear(k_sd, input_size, num_components * 2)
    wro, bro = init_linear(k_ro, input_size, num_components)
    weos, beos = init_linear(k_eos, input_size, 1)
    return dict(wpi=wpi, bpi=bpi, wmu=wmu, bmu=bmu, wsd=wsd, bsd=bsd,
                wro=wro, bro=bro, weos=weos, beos=beos)


def fuse_mdn_params(params):
    """Hoisted out of the forward: build the fused lane-dense weight/bias ONCE.

    Returns (w_fused, b_fused) with w_fused: (round_up(in, 8), round_up(6K+1, 128)).
    The contraction dim is only sublane-aligned (x8), NOT lane-padded to 128.
    """
    in_features, K = params["wpi"].shape
    fused_width = 6 * K + 1                     # pi(K) | mu(2K) | sd(2K) | ro(K) | eos(1)
    k_pad = _round_up(in_features, 8)
    w_pad = _round_up(fused_width, 128)

    w_fused = jnp.concatenate(
        [params["wpi"], params["wmu"], params["wsd"], params["wro"], params["weos"]],
        axis=1)
    b_fused = jnp.concatenate(
        [params["bpi"], params["bmu"], params["bsd"], params["bro"], params["beos"]],
        axis=1)
    w_fused = jnp.pad(w_fused, ((0, k_pad - in_features), (0, w_pad - fused_width)))
    b_fused = jnp.pad(b_fused, ((0, 0), (0, w_pad - fused_width)))
    return w_fused, b_fused


def mixture_density_layer(x, w_fused, b_fused, *, num_components, bias=None):
    """Fused, row-tiled Pallas forward. Returns (pi, mu, sd, ro, eos)."""
    K = int(num_components)
    lead_shape = x.shape[:-1]
    in_features = x.shape[-1]
    k_pad, w_pad = w_fused.shape

    n_rows = 1
    for d in lead_shape:
        n_rows *= d
    x2d = x.reshape(n_rows, in_features)

    # Only sublane-align the contraction dim (block last dim == full array dim,
    # so no 128 lane padding of x in HBM is needed).
    if k_pad != in_features:
        x2d = jnp.pad(x2d, ((0, 0), (0, k_pad - in_features)))

    # Row tiling: large tiles (<= 1024 rows) to amortize per-grid-step overhead,
    # but always >= 2 grid steps when rows allow so v7x's two TensorCores both
    # get work along the "parallel" row axis.
    rows_8 = _round_up(max(n_rows, 1), 8)
    if rows_8 <= 8:
        tile_rows = rows_8
    else:
        tile_rows = min(1024, _round_up((rows_8 + 1) // 2, 8))
    n_rows_p = _round_up(n_rows, tile_rows)
    if n_rows_p != n_rows:
        x2d = jnp.pad(x2d, ((0, n_rows_p - n_rows), (0, 0)))

    grid = (n_rows_p // tile_rows,)
    kernel = functools.partial(mdn_fused_kernel, num_components=K, bias=bias)

    bytes_accessed = (n_rows_p * k_pad * x2d.dtype.itemsize
                      + w_fused.size * w_fused.dtype.itemsize
                      + b_fused.size * b_fused.dtype.itemsize
                      + n_rows_p * w_pad * jnp.dtype(x.dtype).itemsize)
    cost = pl.CostEstimate(
        flops=2 * n_rows_p * k_pad * w_pad,
        transcendentals=2 * n_rows_p * w_pad,   # one exp + one tanh slab sweep
        bytes_accessed=bytes_accessed)

    out = pl.pallas_call(
        kernel,
        out_shape=jax.ShapeDtypeStruct((n_rows_p, w_pad), x.dtype),
        grid=grid,
        in_specs=[
            pl.BlockSpec((tile_rows, k_pad), lambda i: (i, 0)),   # x row tile (full feature dim)
            pl.BlockSpec((k_pad, w_pad), lambda i: (0, 0)),       # fused weight (grid-invariant)
            pl.BlockSpec((1, w_pad), lambda i: (0, 0)),           # fused bias (grid-invariant)
        ],
        out_specs=pl.BlockSpec((tile_rows, w_pad), lambda i: (i, 0)),
        compiler_params=pltpu.CompilerParams(
            dimension_semantics=("parallel",)),
        cost_estimate=cost,
    )(x2d, w_fused, b_fused)

    # Lane-dense slab -> five heads. These slices are plain XLA ops that fuse
    # with downstream consumers when the forward is jit-compiled.
    pi = out[:n_rows, 0:K]
    mu = out[:n_rows, K:3 * K]
    sd = out[:n_rows, 3 * K:5 * K]
    ro = out[:n_rows, 5 * K:6 * K]
    eos = out[:n_rows, 6 * K:6 * K + 1]

    return (pi.reshape(*lead_shape, K),
            mu.reshape(*lead_shape, 2 * K),
            sd.reshape(*lead_shape, 2 * K),
            ro.reshape(*lead_shape, K),
            eos.reshape(*lead_shape, 1))


def mixture_density_layer_ref(x, params, bias=None):
    """Pure-JAX reference mirroring the PyTorch forward (f32-accurate dots)."""
    hp = jax.lax.Precision.HIGHEST
    pi_hat = jnp.dot(x, params["wpi"], precision=hp) + params["bpi"]
    mu = jnp.dot(x, params["wmu"], precision=hp) + params["bmu"]
    sd_hat = jnp.dot(x, params["wsd"], precision=hp) + params["bsd"]
    ro_hat = jnp.dot(x, params["wro"], precision=hp) + params["bro"]
    eos_hat = jnp.dot(x, params["weos"], precision=hp) + params["beos"]
    if bias is None:
        pi = jax.nn.softmax(pi_hat, axis=-1)
        sd = jnp.exp(sd_hat)
    else:
        pi = jax.nn.softmax(pi_hat * (1 + bias), axis=-1)
        sd = jnp.exp(sd_hat - bias)
    return pi, mu, sd, jnp.tanh(ro_hat), jax.nn.sigmoid(eos_hat)


if __name__ == "__main__":
    batch, seq, input_size, num_components = 2, 8, 32, 8

    key = jax.random.PRNGKey(0)
    k_x, k_p = jax.random.split(key)
    x = jax.random.normal(k_x, (batch, seq, input_size), jnp.float32)
    params = init_mdn_params(k_p, input_size, num_components)

    # Fused weight/bias built ONCE (hoisted out of the per-step forward).
    w_fused, b_fused = fuse_mdn_params(params)

    names = ("pi", "mu", "sd", "ro", "eos")
    for bias in (None, 0.5):                      # also exercise the sampling-bias path
        fwd = jax.jit(functools.partial(
            mixture_density_layer, num_components=num_components, bias=bias))
        outs = jax.block_until_ready(fwd(x, w_fused, b_fused))
        refs = mixture_density_layer_ref(x, params, bias=bias)
        for name, o, r in zip(names, outs, refs):
            assert o.shape == r.shape, (name, o.shape, r.shape)
            err = float(jnp.max(jnp.abs(o - r)))
            assert jnp.allclose(o, r, atol=1e-4, rtol=1e-4), (name, bias, err)

    print("KERNEL_OK")
</pallas_src>

<mosaic_0001>
module attributes {stable_mosaic.version = 11 : i64} {
  func.func @mdn_fused_kernel(%arg0: i32, %arg1: memref<8x32xf32, #tpu.memory_space<vmem>>, %arg2: memref<32x128xf32, #tpu.memory_space<vmem>>, %arg3: memref<1x128xf32, #tpu.memory_space<vmem>>, %arg4: memref<8x128xf32, #tpu.memory_space<vmem>>) attributes {dimension_semantics = [#tpu.dimension_semantics<parallel>], iteration_bounds = array<i64: 2>, scalar_prefetch = 0 : i64, scratch_operands = 0 : i64, tpu.core_type = #tpu.core_type<tc>, window_params = [{transform_indices = @transform_0, window_bounds = array<i64: 8, 32>}, {pipeline_mode = #tpu.pipeline_mode<synchronous>, transform_indices = @transform_1, window_bounds = array<i64: 32, 128>}, {pipeline_mode = #tpu.pipeline_mode<synchronous>, transform_indices = @transform_2, window_bounds = array<i64: 1, 128>}, {transform_indices = @transform_3, window_bounds = array<i64: 8, 128>}]} {
    %c0 = arith.constant 0 : index
    %c0_0 = arith.constant 0 : index
    %0 = vector.load %arg1[%c0, %c0_0] : memref<8x32xf32, #tpu.memory_space<vmem>>, vector<8x32xf32>
    %c0_1 = arith.constant 0 : index
    %c0_2 = arith.constant 0 : index
    %1 = vector.load %arg2[%c0_1, %c0_2] : memref<32x128xf32, #tpu.memory_space<vmem>>, vector<32x128xf32>
    %cst = arith.constant dense<0.000000e+00> : vector<8x128xf32>
    %2 = tpu.matmul %0, %1, %cst {dimension_numbers = #tpu.dot_dimension_numbers<[1], [0], [0], [1], [0, 0, 1, 1], [], []>} : vector<8x32xf32>, vector<32x128xf32>, vector<8x128xf32> -> vector<8x128xf32>
    %c0_3 = arith.constant 0 : index
    %c0_4 = arith.constant 0 : index
    %3 = vector.load %arg3[%c0_3, %c0_4] : memref<1x128xf32, #tpu.memory_space<vmem>>, vector<1x128xf32>
    %4 = vector.broadcast %3 : vector<1x128xf32> to vector<8x128xf32>
    %5 = arith.addf %2, %4 : vector<8x128xf32>
    %6 = tpu.iota {dimensions = array<i32: 1>} : vector<1x128xi32>
    %c8_i32 = arith.constant 8 : i32
    %7 = vector.broadcast %c8_i32 : i32 to vector<1x128xi32>
    %8 = arith.cmpi slt, %6, %7 : vector<1x128xi32>
    %c24_i32 = arith.constant 24 : i32
    %9 = vector.broadcast %c24_i32 : i32 to vector<1x128xi32>
    %10 = arith.cmpi sge, %6, %9 : vector<1x128xi32>
    %c40_i32 = arith.constant 40 : i32
    %11 = vector.broadcast %c40_i32 : i32 to vector<1x128xi32>
    %12 = arith.cmpi slt, %6, %11 : vector<1x128xi32>
    %13 = arith.andi %10, %12 : vector<1x128xi1>
    %c40_i32_5 = arith.constant 40 : i32
    %14 = vector.broadcast %c40_i32_5 : i32 to vector<1x128xi32>
    %15 = arith.cmpi sge, %6, %14 : vector<1x128xi32>
    %c48_i32 = arith.constant 48 : i32
    %16 = vector.broadcast %c48_i32 : i32 to vector<1x128xi32>
    %17 = arith.cmpi slt, %6, %16 : vector<1x128xi32>
    %18 = arith.andi %15, %17 : vector<1x128xi1>
    %c48_i32_6 = arith.constant 48 : i32
    %19 = vector.broadcast %c48_i32_6 : i32 to vector<1x128xi32>
    %20 = arith.cmpi eq, %6, %19 : vector<1x128xi32>
    %cst_7 = arith.constant 0xFF800000 : f32
    %21 = vector.shape_cast %8 : vector<1x128xi1> to vector<1x128xi1>
    %22 = vector.broadcast %21 : vector<1x128xi1> to vector<8x128xi1>
    %23 = vector.broadcast %cst_7 : f32 to vector<8x128xf32>
    %24 = arith.select %22, %5, %23 : vector<8x128xi1>, vector<8x128xf32>
    %cst_8 = arith.constant dense<0xFF800000> : vector<8xf32>
    %25 = vector.multi_reduction <maximumf>, %24, %cst_8 [1] : vector<8x128xf32> to vector<8xf32>
    %26 = vector.shape_cast %25 : vector<8xf32> to vector<8x1xf32>
    %27 = vector.broadcast %26 : vector<8x1xf32> to vector<8x128xf32>
    %28 = arith.subf %5, %27 : vector<8x128xf32>
    %cst_9 = arith.constant 0xFF800000 : f32
    %29 = vector.shape_cast %13 : vector<1x128xi1> to vector<1x128xi1>
    %30 = vector.broadcast %29 : vector<1x128xi1> to vector<8x128xi1>
    %31 = vector.broadcast %cst_9 : f32 to vector<8x128xf32>
    %32 = arith.select %30, %5, %31 : vector<8x128xi1>, vector<8x128xf32>
    %33 = vector.shape_cast %8 : vector<1x128xi1> to vector<1x128xi1>
    %34 = vector.broadcast %33 : vector<1x128xi1> to vector<8x128xi1>
    %35 = arith.select %34, %28, %32 : vector<8x128xi1>, vector<8x128xf32>
    %36 = math.exp %35 : vector<8x128xf32>
    %cst_10 = arith.constant 0.000000e+00 : f32
    %37 = vector.shape_cast %8 : vector<1x128xi1> to vector<1x128xi1>
    %38 = vector.broadcast %37 : vector<1x128xi1> to vector<8x128xi1>
    %39 = vector.broadcast %cst_10 : f32 to vector<8x128xf32>
    %40 = arith.select %38, %36, %39 : vector<8x128xi1>, vector<8x128xf32>
    %cst_11 = arith.constant dense<0.000000e+00> : vector<8xf32>
    %41 = vector.multi_reduction <add>, %40, %cst_11 [1] : vector<8x128xf32> to vector<8xf32>
    %42 = vector.shape_cast %41 : vector<8xf32> to vector<8x1xf32>
    %cst_12 = arith.constant 1.000000e+00 : f32
    %43 = vector.broadcast %cst_12 : f32 to vector<8x1xf32>
    %44 = arith.divf %43, %42 : vector<8x1xf32>
    %cst_13 = arith.constant 5.000000e-01 : f32
    %45 = vector.broadcast %cst_13 : f32 to vector<8x128xf32>
    %46 = arith.mulf %45, %5 : vector<8x128xf32>
    %47 = vector.shape_cast %20 : vector<1x128xi1> to vector<1x128xi1>
    %48 = vector.broadcast %47 : vector<1x128xi1> to vector<8x128xi1>
    %49 = arith.select %48, %46, %5 : vector<8x128xi1>, vector<8x128xf32>
    %50 = math.tanh %49 : vector<8x128xf32>
    %51 = vector.broadcast %44 : vector<8x1xf32> to vector<8x128xf32>
    %52 = arith.mulf %36, %51 : vector<8x128xf32>
    %53 = vector.shape_cast %8 : vector<1x128xi1> to vector<1x128xi1>
    %54 = vector.broadcast %53 : vector<1x128xi1> to vector<8x128xi1>
    %55 = arith.select %54, %52, %5 : vector<8x128xi1>, vector<8x128xf32>
    %56 = vector.shape_cast %13 : vector<1x128xi1> to vector<1x128xi1>
    %57 = vector.broadcast %56 : vector<1x128xi1> to vector<8x128xi1>
    %58 = arith.select %57, %36, %55 : vector<8x128xi1>, vector<8x128xf32>
    %59 = vector.shape_cast %18 : vector<1x128xi1> to vector<1x128xi1>
    %60 = vector.broadcast %59 : vector<1x128xi1> to vector<8x128xi1>
    %61 = arith.select %60, %50, %58 : vector<8x128xi1>, vector<8x128xf32>
    %cst_14 = arith.constant 5.000000e-01 : f32
    %62 = vector.broadcast %cst_14 : f32 to vector<8x128xf32>
    %63 = arith.mulf %62, %50 : vector<8x128xf32>
    %cst_15 = arith.constant 5.000000e-01 : f32
    %64 = vector.broadcast %cst_15 : f32 to vector<8x128xf32>
    %65 = arith.addf %63, %64 : vector<8x128xf32>
    %66 = vector.shape_cast %20 : vector<1x128xi1> to vector<1x128xi1>
    %67 = vector.broadcast %66 : vector<1x128xi1> to vector<8x128xi1>
    %68 = arith.select %67, %65, %61 : vector<8x128xi1>, vector<8x128xf32>
    %c0_16 = arith.constant 0 : index
    %c0_17 = arith.constant 0 : index
    %69 = vector.load %arg4[%c0_16, %c0_17] : memref<8x128xf32, #tpu.memory_space<vmem>>, vector<8x128xf32>
    tpu.vector_store %arg4[%c0_16, %c0_17], %68 {strides = array<i32>} : memref<8x128xf32, #tpu.memory_space<vmem>>, vector<8x128xf32>,
    return
  }
  func.func @transform_0(%arg0: i32) -> (i32, i32) {
    %c0_i32 = arith.constant 0 : i32
    %c0_i32_0 = arith.constant 0 : i32
    return %arg0, %c0_i32 : i32, i32
  }
  func.func @transform_1(%arg0: i32) -> (i32, i32) {
    %c0_i32 = arith.constant 0 : i32
    %c0_i32_0 = arith.constant 0 : i32
    %c0_i32_1 = arith.constant 0 : i32
    return %c0_i32, %c0_i32_0 : i32, i32
  }
  func.func @transform_2(%arg0: i32) -> (i32, i32) {
    %c0_i32 = arith.constant 0 : i32
    %c0_i32_0 = arith.constant 0 : i32
    %c0_i32_1 = arith.constant 0 : i32
    return %c0_i32, %c0_i32_0 : i32, i32
  }
  func.func @transform_3(%arg0: i32) -> (i32, i32) {
    %c0_i32 = arith.constant 0 : i32
    %c0_i32_0 = arith.constant 0 : i32
    return %arg0, %c0_i32 : i32, i32
  }
}

</mosaic_0001>

<bundles_post_ra>
// kernel: mixture_density_layer.1
= control target key start
LH: loop header
LB: loop body
LE: loop exit
PB: predicated region body
PF: predicated region fallthrough
CT: control target
= control target key end

     0   :  { %8 = vsyncpa [#allocation3], 0  ;;  %s683_s0 = inlined_call_operand.hbm [shape: f32[16,32], index: 0, kind: input, shape index: {}]   ;;  %s684_s1 = inlined_call_operand.hbm [shape: f32[32,128], index: 1, kind: input, shape index: {}]   ;;  %s685_s2 = inlined_call_operand.vmem [shape: f32[1,128], index: 2, kind: input, shape index: {}]   ;;  %s686_s3 = inlined_call_operand.vmem [shape: f32[16,128], index: 3, kind: output, shape index: {}]  }
   0x1   :  { %10 = vsyncpa [#allocation3 + $0x1], 0 }
   0x2   :  { %11 = vsyncpa [#allocation5], 0  ;;  %s563_s12 = smov 0   ;;  %s565_s13 = smov 0  }
   0x3   :  { %s567_s14 = smov 0   ;;  %s569_s15 = smov 0  }
   0x4 LB: > { %s127_s18 = sshll.u32 %s684_s1, 4  ;;  %s585_s19 = sadd.s32 4294967295, %s538_s15   ;;  %s538_s15 = sphi %s569_s15, %s695_s15   ;;  %s534_s14 = sphi %s567_s14, %s694_s14   ;;  %s530_s13 = sphi %s565_s13, %s693_s13   ;;  %s526_s12 = sphi %s563_s12, %s692_s12   ;;  %s128_s18 = int_to_ptr.hbm [resolvable:$true] %s127_s18 }
   0x5   : > { %p369_p0 = scmp.ge.s32.totalorder %s538_s15, 1  ;;  %p38_p1 = scmp.eq.s32.totalorder %s585_s19, 0 }
   0x6   : > { %p116_p2 = scmp.lt.s32.totalorder %s538_s15, 3  ;;  %s540_s21 = smov [#allocation4]  }
   0x7   : > { %s129_s22 = sshll.u32 %s540_s21, 4  ;;  %s541_s23 = smov 128   ;;  %s130_s22 = int_to_ptr.vmem [resolvable:$true] %s129_s22 }
   0x8   : > { %p590_p3 = pnand %p369_p0, %p116_p2  ;;  %s542_s24 = smov 8  }
   0x9   : > { %s599_s25 = sadd.s32 1, %s538_s15   ;;  %s24_s27 = sadd.s32 1, %s534_s14 }
   0xa   : > { %p387_p4 = pneg %p590_p3  ;;  %s21_s26 = ssub.s32 %s538_s15, %s599_s25 }
   0xb   : > { %p22_p6 = scmp.eq.s32.totalorder %s21_s26, 0  ;;  %p31_p7 = scmp.ne.s32.totalorder %s534_s14, %s530_s13 }
   0xc   : > { %p388_p5 = pnand %p387_p4, %p38_p1  ;;  %p32_p8 = scmp.eq.s32.totalorder %s538_s15, 0 }
   0xd   : > { %p37_p9 = scmp.ne.s32.totalorder %s530_s13, %s526_s12  ;;  %p396_p12 = scmp.lt.s32.totalorder %s538_s15, 2 }
   0xe   : > { %390 = dma.hbm_to_vmem [thread:$0]  (!%p388_p5), %s128_s18, 512, %s130_s22, [#allocation5], %s541_s23, %s541_s23, %s542_s24  }
   0xf   : > { %s609_s28 = scalar_select %p22_p6, %s534_s14, %s24_s27  }
  0x10   : > { %p33_p10 = por %p32_p8, %p31_p7  ;;  %p613_p11 = por %p38_p1, %p37_p9 }
  0x11   : > { %s146_s30 = sand.u32 1, %s534_s14   ;;  %s373_s5 = sshll.u32 %s538_s15, 3 }
  0x12   : > { %s372_s4 = sshll.u32 %s146_s30, 3  ;;  %s154_s8 = scalar_lea.hbm %s683_s0, %s373_s5 }
  0x13   : > { %s150_s9 = scalar_lea.vmem [#allocation2], %s372_s4  ;;  %s156_s11 = sshll.u32 %s154_s8, 4  ;;  %s157_s11 = int_to_ptr.hbm [resolvable:$true] %s156_s11 }
  0x14   : > { %s158_s10 = sshll.u32 %s150_s9, 4  ;;  %p623_p13 = pnand %p396_p12, %p33_p10  ;;  %s159_s10 = int_to_ptr.vmem [resolvable:$true] %s158_s10 }
  0x15   : > { %s147_s16 = scalar_lea.sflag [#allocation3], %s146_s30  ;;  %s470_s17 = sshra.s32 %s157_s11, 4  ;;  %s471_s17 = int_to_ptr.hbm [resolvable:$true] %s470_s17 }
  0x16   : > { %s472_s18 = scalar_lea.hbm %s471_s17, 8  ;;  %p474_p2 = pneg %p623_p13 }
  0x17   : > { %p473_p0 = scmp.ne.s32.totalorder %s471_s17, %s472_s18  ;;  %s477_s22 = scalar_lea.hbm %s683_s0, 16 }
  0x18   : > { %p478_p6 = scmp.lt.s32.totalorder %s471_s17, %s683_s0  ;;  %p479_p7 = scmp.lt.s32.totalorder %s477_s22, %s472_s18 }
  0x19   : > { %p475_p4 = pnand %p474_p2, %p473_p0 }
  0x1a   : > { %p480_p8 = por %p479_p7, %p478_p6 }
  0x1b   : > { %p476_p5 = pneg %p475_p4 }
  0x1d   : > { %p481_p9 = pnand %p480_p8, %p476_p5 }
  0x1f   : > { %484 = shalt.err (!%p481_p9)
}
  0x20   : > { %394 = dma.hbm_to_vmem [thread:$0]  (!%p623_p13), %s157_s11, 128, %s159_s10, %s147_s16  }
  0x21   : > { %167 = sbr.rel (%p590_p3) target bundleno = 447 (0x1bf), region = 32  ;;  %s169_s26 = sand.u32 (!%p590_p3), 1, %s530_s13  }
  0x22   : > { %s375_s27 = sshll.u32 (!%p590_p3), %s169_s26, 3  ;;  %s170_s30 = scalar_lea.sflag (!%p590_p3), [#allocation3], %s169_s26 }
  0x23   : > { %s173_s4 = scalar_lea.vmem (!%p590_p3), [#allocation2], %s375_s27 }
  0x26   : > { %517 = dma.done.wait (%p613_p11), %s170_s30, 128  }
  0x27   : > { %519 = vsyncadd (%p613_p11), %s170_s30, 4294967168 }
  0x28   : > { %521 = dma.done.wait (%p38_p1), [#allocation5], 512  }
  0x29   : > { %523 = vsyncadd (%p38_p1), [#allocation5], 4294966784  ;;  %v209_v0 = vld [vmem:[#allocation4 + $0x18] sm:$0xff]  ;;  %v208_v1 = vld [vmem:[#allocation4 + $0x10] sm:$0xff]  ;;  %vm214_vm0 = vcmask 261120   ;;  %v238_v5 = vlaneseq  ;;  %p201_p1 = scmp.lt.s32.totalorder %s585_s19, 1 }
  0x2a   : > { %230 = vmatpush.msra.mxu0 %v209_v0  ;;  %v207_v2 = vld [vmem:[#allocation4 + $0x8] sm:$0xff]  ;;  %v206_v3 = vld [vmem:[#allocation4] sm:$0xff]  ;;  %v205_v4 = vld [vmem:[%s173_s4] sm:$0xff] }
  0x2b   : > { %v239_v6 = vand.u32 127, %v238_v5  ;;  %v433_v7 = vld [vmem:[%s685_s2] ss:$0 sm:$0xff]  ;;  %s697_s19 = smov (!%p201_p1, %s585_s19), 1 }
  0x2c   : > { %231 = vmatpush.msra.mxu0 %v208_v1  ;;  %s377_s5 = sshll.u32 %s697_s19, 3 }
  0x2d   : > { %vm240_vm1 = vcmp.lt.s32.totalorder %v239_v6, 8  ;;  %vm241_vm2 = vcmp.ge.s32.totalorder %v239_v6, 24  ;;  %vm242_vm3 = vcmp.lt.s32.totalorder %v239_v6, 40  ;;  %vm247_vm5 = vcmp.eq.s32.totalorder %v239_v6, 48  ;;  %s204_s8 = scalar_lea.vmem %s686_s3, %s377_s5 }
  0x2e   : > { %232 = vmatpush.msra.mxu0 %v207_v2  ;;  %vm652_vm4 = vmand %vm241_vm2, %vm242_vm3  ;;  %vm244_vm9 = vcmp.ge.s32.totalorder %v239_v6, 40  ;;  %vm245_vm10 = vcmp.lt.s32.totalorder %v239_v6, 48 }
  0x2f   : > { %vm246_vm12 = vmand %vm244_vm9, %vm245_vm10 }
  0x30   : > { %233 = vmatpush.msra.mxu0 %v206_v3 }
  0x31   : > { %378 = vmatmul.msk.f32.vlgmr.msra.gmra.mxu0 %vm214_vm0, %v205_v4 }
  0xae   : > { %v235_v8 = vpop.f32.mrf.mxu0 }
  0xaf   : > { %v236_v9 = vadd.f32 %v433_v7, %v235_v8 }
  0xb1   : > { %v250_v10 = vsel %vm240_vm1, %v236_v9, -inf  ;;  %v256_v14 = vsel %vm652_vm4, %v236_v9, -inf  ;;  %v278_v20 = vmul.f32 0.5, %v236_v9 }
  0xb2   : > { %251 = vmax.xlane.f32.xlu0 %v250_v10 }
  0xb3   : > { %v281_v21 = vsel %vm247_vm5, %v278_v20, %v236_v9 }
 0x125   : > { %v252_v12 = vpop.xlane.xlu0 %251 }
 0x126   : > { %v253_v13 = vsub.f32 %v236_v9, %v252_v12 }
 0x128   : > { %v257_v15 = vsel %vm240_vm1, %v253_v13, %v256_v14 }
 0x129   : > { %v258_v16 = vmul.f32 1.442695, %v257_v15 }
 0x12b   : > { %434 = vpow2.f32 %v258_v16 }
 0x131   : > { %v435_v17 = vpop.eup %434 }
 0x132   : > { %v260_v18 = vsel %vm240_vm1, %v435_v17, 0.0 }
 0x133   : > { %261 = vadd.xlane.f32.xlu0 %v260_v18 }
 0x1a6   : > { %v262_v19 = vpop.xlane.xlu0 %261 }
 0x1a7   : > { %436 = vrcp.f32 %v262_v19  ;;  %v274_v25 = vand.u32 2147483648, %v262_v19  ;;  %v272_v27 = vand.u32 2147483647, %v262_v19  ;;  %vm268_vm7 = vweird.f32 %v262_v19 }
 0x1a8   : > { %438 = vtanh.f32 %v281_v21 }
 0x1a9   : > { %v275_v30 = vor.u32 1.1754944e-38, %v274_v25  ;;  %vm273_vm11 = vcmp.eq.f32.partialorder %v272_v27, 8.507059e+37 }
 0x1ad   : > { %v437_v22 = vpop.eup %436 }
 0x1ae   : > { %v264_v23 = vmul.f32 %v437_v22, %v262_v19  ;;  %vm269_vm6 = vweird.f32 %v437_v22  ;;  %v439_v28 = vpop.eup %438 }
 0x1af   : > { %vm270_vm8 = vmor %vm268_vm7, %vm269_vm6  ;;  %v289_v32 = vmul.f32 0.5, %v439_v28 }
 0x1b0   : > { %v265_v24 = vsub.f32 1.0, %v264_v23 }
 0x1b1   : > { %v290_v36 = vadd.f32 0.5, %v289_v32 }
 0x1b2   : > { %v266_v26 = vmul.f32 %v437_v22, %v265_v24 }
 0x1b4   : > { %v267_v29 = vadd.f32 %v437_v22, %v266_v26 }
 0x1b6   : > { %v271_v31 = vsel %vm270_vm8, %v437_v22, %v267_v29 }
 0x1b7   : > { %v276_v33 = vsel %vm273_vm11, %v275_v30, %v271_v31 }
 0x1b8   : > { %v283_v34 = vmul.f32 %v435_v17, %v276_v33 }
 0x1ba   : > { %v284_v35 = vsel %vm240_vm1, %v283_v34, %v236_v9 }
 0x1bb   : > { %v285_v37 = vsel %vm652_vm4, %v435_v17, %v284_v35 }
 0x1bc   : > { %v288_v38 = vsel %vm246_vm12, %v439_v28, %v285_v37 }
 0x1bd   : > { %v291_v39 = vsel %vm247_vm5, %v290_v36, %v288_v38 }
 0x1be   : > { %292 = vst [vmem:[%s204_s8] sm:$0xff] %v291_v39 }
 0x1bf PF: > { %p14_p3 = scmp.ge.s32.totalorder %s599_s25, 4   ;;  %s692_s12 = smov %s530_s13 }
 0x1c0   : > { %s693_s13 = smov %s534_s14  ;;  %s694_s14 = smov %s609_s28 }
 0x1c1   : > { %s695_s15 = smov %s599_s25  ;;  %16 = sbr.rel (!%p14_p3) target bundleno = 4 (0x4), region = 76 }
 0x1c6   :  { %312 = vsyncpa [#allocation3], 1 }
 0x1c7   :  { %314 = vsyncpa [#allocation3 + $0x1], 1 }
 0x1c8   :  { %315 = vsyncpa [#allocation5], 1 }

</bundles_post_ra>
